<compile_context>
chip_gen: v7x
topology: tpu7x:2x2x1
jax: 0.10.0
libtpu: 0.0.40
codegen_flags: <defaults>
</compile_context>

<pallas_src>
import math
import functools

import jax
import jax.numpy as jnp
from jax import lax
from jax.experimental import pallas as pl
from jax.experimental.pallas import tpu as pltpu

# The PyTorch module uses the *global* time_size=192 inside div_term,
# independent of the `time` argument.  Keep that semantic.
TIME_SIZE = 192


def build_pe(time: int, features: int, dtype=jnp.float32) -> jnp.ndarray:
    """Sin/cos positional-encoding table, same math as the torch __init__.

    Built as (1, T, F): the table is batch-invariant, so it is never
    replicated over the batch (saves HBM traffic and memory).
    """
    position = jnp.arange(time, dtype=jnp.float32)[:, None]                  # (T, 1)
    div_term = jnp.exp(
        jnp.arange(0, features, 2, dtype=jnp.float32)
        * (-math.log(10000.0) / TIME_SIZE)
    )                                                                         # (ceil(F/2),)
    angles = position * div_term                                              # (T, ceil(F/2))
    pe = jnp.zeros((time, features), dtype=jnp.float32)
    pe = pe.at[:, 0::2].set(jnp.sin(angles))
    pe = pe.at[:, 1::2].set(jnp.cos(angles)[:, : features // 2])
    return pe[None].astype(dtype)                                             # (1, T, F)


def _pe_kernel_eval(seed_ref, x_ref, pe_ref, o_ref):
    # Eval mode: dropout is identity.  pe block (1, T, F) is VMEM-resident
    # across the whole grid (constant index_map) and broadcasts over batch.
    o_ref[...] = (x_ref[...] + pe_ref[...]).astype(o_ref.dtype)


def _threshold_u32(p: float) -> jnp.uint32:
    return jnp.uint32(min(int(p * 4294967296.0), 4294967295))


def _hash_u32(z):
    # murmur3-style finalizer: portable VPU-only integer mixing (fallback RNG).
    z = (z ^ (z >> 16)) * jnp.uint32(0x85EBCA6B)
    z = (z ^ (z >> 13)) * jnp.uint32(0xC2B2AE35)
    z = z ^ (z >> 16)
    return z


def _pe_kernel_train_hw(p: float, seed_ref, x_ref, pe_ref, o_ref):
    # Inverted dropout with the hardware PRNG: one bits draw for the whole
    # block, one add, one select, one multiply, one big store.
    inv_keep = 1.0 / (1.0 - p)
    threshold = _threshold_u32(p)

    # Re-seed per grid step so different batch blocks get different streams.
    pltpu.prng_seed(seed_ref[0], pl.program_id(0))
    bits = pltpu.prng_random_bits(o_ref.shape).astype(jnp.uint32)

    y = x_ref[...] + pe_ref[...]                                  # (bb,T,F)
    o_ref[...] = (jnp.where(bits >= threshold, y, 0.0) * inv_keep).astype(o_ref.dtype)


def _pe_kernel_train_hash(p: float, seed_ref, x_ref, pe_ref, o_ref):
    # Portable fallback (interpret mode / non-TPU backends): counter-based
    # hash of the global element index.  Fully vectorized over the block.
    Bb, T, F = o_ref.shape
    inv_keep = 1.0 / (1.0 - p)
    threshold = _threshold_u32(p)

    b_idx = lax.broadcasted_iota(jnp.int32, (Bb, T, F), 0)
    t_idx = lax.broadcasted_iota(jnp.int32, (Bb, T, F), 1)
    f_idx = lax.broadcasted_iota(jnp.int32, (Bb, T, F), 2)
    base_b = pl.program_id(0) * Bb
    gid = (((base_b + b_idx) * T + t_idx) * F + f_idx).astype(jnp.uint32)
    seed = seed_ref[0].astype(jnp.uint32) * jnp.uint32(0x9E3779B9)
    bits = _hash_u32(gid + seed)

    y = x_ref[...] + pe_ref[...]
    o_ref[...] = (jnp.where(bits >= threshold, y, 0.0) * inv_keep).astype(o_ref.dtype)


def positional_encoding(x: jnp.ndarray,
                        pe: jnp.ndarray,
                        *,
                        dropout_p: float = 0.1,
                        training: bool = False,
                        seed: int = 0,
                        block_bytes: int = 4 * 1024 * 1024,
                        use_hw_prng: bool | None = None) -> jnp.ndarray:
    """x: (B, T, F); pe: (1, T, F) from build_pe()."""
    B, T, F = x.shape
    assert pe.shape == (1, T, F)
    pe = pe.astype(x.dtype)   # compute in the input dtype (no bf16 upcast)

    train = training and dropout_p > 0.0
    if train and dropout_p >= 1.0:
        return jnp.zeros_like(x)  # torch dropout(p=1.0) zeroes everything

    if use_hw_prng is None:
        use_hw_prng = jax.default_backend() == "tpu"

    # Pack several batch elements per grid step so each block is ~block_bytes
    # (x and out are each double-buffered -> working set ~ 4 x block + pe).
    per_batch = T * F * x.dtype.itemsize
    max_bb = max(1, block_bytes // per_batch)
    if B >= 2:
        # Guarantee >= 2 grid steps so v7x megacore can shard the batch axis.
        max_bb = min(max_bb, pl.cdiv(B, 2))
    bb = max(1, min(B, max_bb))
    grid = (pl.cdiv(B, bb),)   # tail block (if any) is padded/masked by Pallas

    if train:
        kernel = functools.partial(
            _pe_kernel_train_hw if use_hw_prng else _pe_kernel_train_hash,
            float(dropout_p))
    else:
        kernel = _pe_kernel_eval

    seed_arr = jnp.asarray([seed], dtype=jnp.int32)

    grid_spec = pltpu.PrefetchScalarGridSpec(
        num_scalar_prefetch=1,
        grid=grid,
        in_specs=[
            pl.BlockSpec((bb, T, F), lambda i, seed_ref: (i, 0, 0)),
            # Constant block index -> PE stays resident in VMEM (one HBM read).
            pl.BlockSpec((1, T, F), lambda i, seed_ref: (0, 0, 0)),
        ],
        out_specs=pl.BlockSpec((bb, T, F), lambda i, seed_ref: (i, 0, 0)),
    )

    # TODO(synk): if real workloads have F not a multiple of 128, fold T into
    # the lane dim (or pad F) in this wrapper to keep stores lane-dense.
    return pl.pallas_call(
        kernel,
        out_shape=jax.ShapeDtypeStruct((B, T, F), x.dtype),
        grid_spec=grid_spec,
        compiler_params=pltpu.CompilerParams(
            # Grid steps are independent -> allow megacore sharding on v7x.
            dimension_semantics=("parallel",),
            # Room for 2 double-buffered ~4 MiB streams + pe on every gen
            # (v7x physical VMEM is only 64 MiB, so stay well under it).
            vmem_limit_bytes=48 * 1024 * 1024,
        ),
    )(seed_arr, x, pe)


if __name__ == "__main__":
    # Small shapes consistent with the module layout (batch, time, features).
    B, T, F = 2, 8, 128

    key = jax.random.PRNGKey(0)
    x = jax.random.normal(key, (B, T, F), dtype=jnp.float32)
    pe = build_pe(T, F)

    # Eval-mode forward (dropout identity): must equal x + pe exactly.
    out = jax.block_until_ready(
        positional_encoding(x, pe, dropout_p=0.1, training=False))
    ref = x + pe  # pe broadcasts over batch
    assert out.shape == (B, T, F)
    assert jnp.allclose(out, ref, atol=1e-6, rtol=1e-6)

    # Train-mode forward (inverted dropout in-kernel): every element must be
    # either 0 (dropped) or (x+pe)/(1-p) (kept & rescaled).
    # TODO(synk): dropout uses the TPU hardware PRNG, not torch's RNG stream.
    p = 0.1
    out_tr = jax.block_until_ready(
        positional_encoding(x, pe, dropout_p=p, training=True, seed=42))
    assert out_tr.shape == (B, T, F)
    scaled = ref / (1.0 - p)
    ok = (jnp.isclose(out_tr, 0.0, atol=1e-6)
          | jnp.isclose(out_tr, scaled, rtol=1e-5, atol=1e-5))
    assert bool(jnp.all(ok))

    print("KERNEL_OK")
</pallas_src>

<mosaic_0001>
module attributes {stable_mosaic.version = 11 : i64} {
  func.func @_pe_kernel_eval(%arg0: i32, %arg1: memref<1xi32, #tpu.memory_space<smem>>, %arg2: memref<1x8x128xf32, #tpu.memory_space<vmem>>, %arg3: memref<1x8x128xf32, #tpu.memory_space<vmem>>, %arg4: memref<1x8x128xf32, #tpu.memory_space<vmem>>) attributes {dimension_semantics = [#tpu.dimension_semantics<parallel>], iteration_bounds = array<i64: 2>, scalar_prefetch = 1 : i64, scratch_operands = 0 : i64, tpu.core_type = #tpu.core_type<tc>, window_params = [{transform_indices = @transform_0, window_bounds = array<i64: 1, 8, 128>}, {pipeline_mode = #tpu.pipeline_mode<synchronous>, transform_indices = @transform_1, window_bounds = array<i64: 1, 8, 128>}, {transform_indices = @transform_2, window_bounds = array<i64: 1, 8, 128>}]} {
    %c0 = arith.constant 0 : index
    %c0_0 = arith.constant 0 : index
    %c0_1 = arith.constant 0 : index
    %0 = vector.load %arg2[%c0, %c0_0, %c0_1] : memref<1x8x128xf32, #tpu.memory_space<vmem>>, vector<1x8x128xf32>
    %c0_2 = arith.constant 0 : index
    %c0_3 = arith.constant 0 : index
    %c0_4 = arith.constant 0 : index
    %1 = vector.load %arg3[%c0_2, %c0_3, %c0_4] : memref<1x8x128xf32, #tpu.memory_space<vmem>>, vector<1x8x128xf32>
    %2 = arith.addf %0, %1 : vector<1x8x128xf32>
    %c0_5 = arith.constant 0 : index
    %c0_6 = arith.constant 0 : index
    %c0_7 = arith.constant 0 : index
    %3 = vector.load %arg4[%c0_5, %c0_6, %c0_7] : memref<1x8x128xf32, #tpu.memory_space<vmem>>, vector<1x8x128xf32>
    tpu.vector_store %arg4[%c0_5, %c0_6, %c0_7], %2 {strides = array<i32>} : memref<1x8x128xf32, #tpu.memory_space<vmem>>, vector<1x8x128xf32>,
    return
  }
  func.func @transform_0(%arg0: i32, %arg1: memref<1xi32, #tpu.memory_space<smem>>) -> (i32, i32, i32) {
    %c0_i32 = arith.constant 0 : i32
    %c0_i32_0 = arith.constant 0 : i32
    %c0_i32_1 = arith.constant 0 : i32
    return %arg0, %c0_i32, %c0_i32_0 : i32, i32, i32
  }
  func.func @transform_1(%arg0: i32, %arg1: memref<1xi32, #tpu.memory_space<smem>>) -> (i32, i32, i32) {
    %c0_i32 = arith.constant 0 : i32
    %c0_i32_0 = arith.constant 0 : i32
    %c0_i32_1 = arith.constant 0 : i32
    %c0_i32_2 = arith.constant 0 : i32
    return %c0_i32, %c0_i32_0, %c0_i32_1 : i32, i32, i32
  }
  func.func @transform_2(%arg0: i32, %arg1: memref<1xi32, #tpu.memory_space<smem>>) -> (i32, i32, i32) {
    %c0_i32 = arith.constant 0 : i32
    %c0_i32_0 = arith.constant 0 : i32
    %c0_i32_1 = arith.constant 0 : i32
    return %arg0, %c0_i32, %c0_i32_0 : i32, i32, i32
  }
}

</mosaic_0001>

<bundles_post_ra>
// kernel: tpu_custom_call.1
= control target key start
LH: loop header
LB: loop body
LE: loop exit
PB: predicated region body
PF: predicated region fallthrough
CT: control target
= control target key end

     0   :  { %9 = vsyncpa [#allocation5], 0  ;;  %s697_s0 = inlined_call_operand.<no memory space> [shape: s32[1], index: 0, kind: input, shape index: {}]   ;;  %s698_s1 = inlined_call_operand.hbm [shape: f32[2,8,128], index: 1, kind: input, shape index: {}]   ;;  %s699_s2 = inlined_call_operand.hbm [shape: f32[1,8,128], index: 2, kind: input, shape index: {}]   ;;  %s700_s3 = inlined_call_operand.hbm [shape: f32[2,8,128], index: 3, kind: output, shape index: {}]  }
   0x1   :  { %11 = vsyncpa [#allocation5 + $0x1], 0 }
   0x2   :  { %12 = vsyncpa [#allocation8], 0 }
   0x3   :  { %13 = vsyncpa [#allocation6], 0 }
   0x4   :  { %15 = vsyncpa [#allocation6 + $0x1], 0  ;;  %s496_s12 = smov 0   ;;  %s498_s13 = smov 0  }
   0x5   :  { %s500_s14 = smov 0   ;;  %s502_s0 = smov 0  }
   0x6 LB: > { %s517_s15 = sadd.s32 4294967295, %s471_s0   ;;  %s272_s16 = sadd.s32 4294967294, %s471_s0   ;;  %s471_s0 = sphi %s502_s0, %s724_s0   ;;  %s467_s14 = sphi %s500_s14, %s723_s14   ;;  %s463_s13 = sphi %s498_s13, %s722_s13   ;;  %s459_s12 = sphi %s496_s12, %s721_s12  }
   0x7   : > { %p41_p0 = scmp.ne.s32.totalorder %s463_s13, %s459_s12  ;;  %p701_p1 = scmp.eq.s32.totalorder %s517_s15, 0 }
   0x8   : > { %p92_p3 = scmp.eq.s32.totalorder %s272_s16, 1  ;;  %p273_p5 = scmp.ge.s32.totalorder %s471_s0, 1 }
   0x9   : > { %p526_p4 = por %p701_p1, %p41_p0  ;;  %p99_p7 = scmp.lt.s32.totalorder %s471_s0, 3 }
   0xa   : > { %p531_p6 = por %p92_p3, %p41_p0  ;;  %s473_s20 = smov [#allocation7]  }
   0xb   : > { %s704_s17 = scalar_select %p526_p4, 1, 0 }
   0xc   : > { %s705_s18 = scalar_select %p531_p6, 1, 0 }
   0xd   : > { %p536_p8 = pnand %p273_p5, %p99_p7  ;;  %s112_s21 = sshll.u32 %s473_s20, 4  ;;  %s113_s21 = int_to_ptr.vmem [resolvable:$true] %s112_s21 }
   0xe   : > { %s544_s22 = sadd.s32 1, %s471_s0   ;;  %s28_s26 = sadd.s32 1, %s467_s14 }
   0xf   : > { %s706_s19 = scalar_select %p536_p8, 1, 0 }
  0x10   : > { %p294_p10 = pneg %p536_p8  ;;  %s25_s24 = ssub.s32 %s471_s0, %s544_s22 }
  0x11   : > { %p554_p12 = scmp.eq.s32.totalorder %s25_s24, 0  ;;  %s343_s29 = scalar_lea.hbm %s699_s2, 128 }
  0x12   : > { %p548_p11 = pnand %p294_p10, %p701_p1  ;;  %p344_p0 = scmp.ne.s32.totalorder %s699_s2, %s343_s29 }
  0x13   : > { %s708_s25 = scalar_select %p554_p12, 1, 0 }
  0x14   : > { %p345_p3 = pneg %p548_p11  ;;  %p350_p10 = scmp.lt.u32.totalorder %s343_s29, %s699_s2 }
  0x16   : > { %p346_p5 = pnand %p345_p3, %p344_p0 }
  0x18   : > { %p347_p7 = pneg %p346_p5 }
  0x1a   : > { %p352_p9 = pnand %p350_p10, %p347_p7 }
  0x1c   : > { %355 = shalt.err (!%p352_p9)
}
  0x1d   : > { %s356_s7 = scalar_lea.vmem %s113_s21, 128  ;;  %p364_p6 = scmp.lt.s32.totalorder %s113_s21, %s113_s21 }
  0x1e   : > { %p357_p1 = scmp.ne.s32.totalorder %s113_s21, %s356_s7  ;;  %p365_p4 = scmp.lt.s32.totalorder %s356_s7, %s356_s7 }
  0x20   : > { %p359_p2 = pnand %p357_p1, %p345_p3  ;;  %p366_p8 = por %p365_p4, %p364_p6 }
  0x22   : > { %p360_p13 = pneg %p359_p2 }
  0x24   : > { %p367_p12 = pnand %p366_p8, %p360_p13 }
  0x26   : > { %370 = shalt.err (!%p367_p12)
}
  0x27   : > { %297 = dma.hbm_to_vmem [thread:$0]  (!%p548_p11), %s699_s2, 128, %s113_s21, [#allocation8]  }
  0x28   : > { %p709_p1 = scmp.ne.s32.totalorder %s708_s25, 0  ;;  %p36_p2 = scmp.eq.s32.totalorder %s471_s0, 0 }
  0x29   : > { %p710_p4 = scmp.ne.s32.totalorder %s467_s14, %s463_s13  ;;  %p711_p6 = scmp.eq.s32.totalorder %s517_s15, 1 }
  0x2a   : > { %s580_s10 = scalar_select %p709_p1, %s467_s14, %s28_s26  }
  0x2b   : > { %p588_p8 = por %p711_p6, %p710_p4  ;;  %p307_p9 = scmp.lt.s32.totalorder %s471_s0, 2 }
  0x2c   : > { %s123_s16 = sand.u32 1, %s467_s14   ;;  %p713_p12 = pmov %p710_p4 }
  0x2d   : > { %s276_s20 = sshll.u32 %s123_s16, 3  ;;  %s277_s23 = sshll.u32 %s471_s0, 7 }
  0x2e   : > { %p37_p13 = por %p36_p2, %p713_p12  ;;  %s601_s21 = scalar_lea.hbm %s698_s1, %s277_s23 }
  0x2f   : > { %s127_s25 = scalar_lea.vmem [#allocation4], %s276_s20  ;;  %s124_s29 = scalar_lea.sflag [#allocation5], %s123_s16 }
  0x30   : > { %s134_s26 = sshll.u32 %s127_s25, 4  ;;  %p603_p11 = pnand %p307_p9, %p37_p13  ;;  %s607_s26 = int_to_ptr.vmem [resolvable:$true] %s134_s26 }
  0x31   : > { %s371_s30 = scalar_lea.hbm %s601_s21, 128  ;;  %s376_s6 = scalar_lea.hbm %s698_s1, 256 }
  0x32   : > { %p372_p0 = scmp.ne.s32.totalorder %s601_s21, %s371_s30  ;;  %p373_p3 = pneg %p603_p11 }
  0x33   : > { %p377_p10 = scmp.lt.u32.totalorder %s601_s21, %s698_s1  ;;  %p378_p1 = scmp.lt.u32.totalorder %s376_s6, %s371_s30 }
  0x34   : > { %p374_p5 = pnand %p373_p3, %p372_p0  ;;  %p380_p4 = scmp.lt.u32.totalorder %s371_s30, %s601_s21 }
  0x35   : > { %p379_p2 = por %p378_p1, %p377_p10 }
  0x36   : > { %p375_p7 = pneg %p374_p5 }
  0x37   : > { %p381_p6 = por %p380_p4, %p379_p2 }
  0x39   : > { %p382_p9 = pnand %p381_p6, %p375_p7 }
  0x3b   : > { %385 = shalt.err (!%p382_p9)
}
  0x3c   : > { %s386_s9 = scalar_lea.vmem %s607_s26, 128  ;;  %s474_s16 = smov [#allocation4]  }
  0x3d   : > { %p387_p12 = scmp.ne.s32.totalorder %s607_s26, %s386_s9  ;;  %s391_s20 = sshll.u32 %s474_s16, 4  ;;  %s392_s20 = int_to_ptr.vmem [resolvable:$false] %s391_s20 }
  0x3e   : > { %s393_s23 = scalar_lea.vmem %s392_s20, 256  ;;  %p394_p5 = scmp.lt.s32.totalorder %s607_s26, %s392_s20 }
  0x3f   : > { %p389_p13 = pnand %p387_p12, %p373_p3  ;;  %p395_p10 = scmp.lt.s32.totalorder %s393_s23, %s386_s9 }
  0x41   : > { %p390_p0 = pneg %p389_p13  ;;  %p396_p1 = por %p395_p10, %p394_p5 }
  0x43   : > { %p397_p2 = pnand %p396_p1, %p390_p0 }
  0x45   : > { %400 = shalt.err (!%p397_p2)
}
  0x46   : > { %301 = dma.hbm_to_vmem [thread:$0]  (!%p603_p11), %s601_s21, 128, %s607_s26, %s124_s29  }
  0x47   : > { %p715_p7 = scmp.ne.s32.totalorder %s706_s19, 0 }
  0x48   : > { %s637_s24 = sand.u32 (!%p715_p7), 1, %s463_s13   ;;  %p716_p3 = scmp.ne.s32.totalorder (!%p715_p7), %s704_s17, 0 }
  0x49   : > { %143 = sbr.rel (%p715_p7) target bundleno = 109 (0x6d), region = 28  ;;  %s279_s27 = sshll.u32 (!%p715_p7), %s637_s24, 3 }
  0x4a   : > { %s146_s25 = scalar_lea.sflag (!%p715_p7), [#allocation5], %s637_s24  ;;  %s149_s30 = scalar_lea.vmem (!%p715_p7), [#allocation4], %s279_s27 }
  0x50   : > { %446 = dma.done.wait (%p716_p3), %s146_s25, 128  }
  0x51   : > { %448 = vsyncadd (%p716_p3), %s146_s25, 4294967168  ;;  %p717_p4 = scmp.eq.s32.totalorder %s517_s15, 0 }
  0x53   : > { %450 = dma.done.wait (%p717_p4), [#allocation8], 128   ;;  %p718_p11 = pmov %p717_p4 }
  0x54   : > { %s173_s19 = scalar_lea.vmem [#allocation9], %s279_s27  ;;  %s283_s26 = sshll.u32 %s517_s15, 7  ;;  %v174_v0 = vld [vmem:[%s149_s30] sm:$0xff]  ;;  %v175_v1 = vld [vmem:[#allocation7] sm:$0xff] }
  0x55   : > { %452 = vsyncadd (%p718_p11), [#allocation8], 4294967168  ;;  %s192_s21 = sshll.u32 %s173_s19, 4  ;;  %v176_v2 = vadd.f32 %v175_v1, %v174_v0  ;;  %s655_s29 = scalar_lea.hbm %s700_s3, %s283_s26  ;;  %s650_s21 = int_to_ptr.vmem [resolvable:$true] %s192_s21 }
  0x56   : > { %s179_s4 = scalar_lea.sflag [#allocation6], %s637_s24  ;;  %s401_s5 = scalar_lea.vmem %s650_s21, 128 }
  0x57   : > { %177 = vst [vmem:[%s173_s19] sm:$0xff] %v176_v2  ;;  %p402_p6 = scmp.ne.s32.totalorder %s650_s21, %s401_s5  ;;  %s475_s15 = smov [#allocation9]  }
  0x58   : > { %s405_s6 = sshll.u32 %s475_s15, 4  ;;  %s406_s6 = int_to_ptr.vmem [resolvable:$false] %s405_s6 }
  0x59   : > { %p403_p9 = pnand %p402_p6, %p588_p8  ;;  %s407_s7 = scalar_lea.vmem %s406_s6, 256 }
  0x5a   : > { %p408_p13 = scmp.lt.s32.totalorder %s650_s21, %s406_s6  ;;  %p409_p0 = scmp.lt.s32.totalorder %s407_s7, %s401_s5 }
  0x5b   : > { %p404_p12 = pneg %p403_p9 }
  0x5c   : > { %p410_p5 = por %p409_p0, %p408_p13 }
  0x5e   : > { %p411_p10 = pnand %p410_p5, %p404_p12 }
  0x60   : > { %414 = shalt.err (!%p411_p10)
}
  0x61   : > { %s415_s8 = scalar_lea.hbm %s655_s29, 128  ;;  %s419_s20 = scalar_lea.hbm %s700_s3, 256 }
  0x62   : > { %p416_p1 = scmp.ne.s32.totalorder %s655_s29, %s415_s8  ;;  %p420_p3 = scmp.lt.u32.totalorder %s655_s29, %s700_s3 }
  0x63   : > { %p421_p4 = scmp.lt.u32.totalorder %s419_s20, %s415_s8  ;;  %p423_p6 = scmp.lt.u32.totalorder %s415_s8, %s655_s29 }
  0x64   : > { %p417_p2 = pnand %p416_p1, %p588_p8 }
  0x65   : > { %p422_p11 = por %p421_p4, %p420_p3 }
  0x66   : > { %p418_p7 = pneg %p417_p2 }
  0x67   : > { %p424_p9 = por %p423_p6, %p422_p11 }
  0x69   : > { %p425_p12 = pnand %p424_p9, %p418_p7 }
  0x6b   : > { %428 = shalt.err (!%p425_p12)
}
  0x6c   : > { %292 = dma.vmem_to_hbm [thread:$0]  (%p588_p8), %s650_s21, 128, %s655_s29, %s179_s4  }
  0x6d PF: > { %s204_s27 = sand.u32 1, %s459_s12   ;;  %p719_p13 = scmp.ne.s32.totalorder %s705_s18, 0 }
  0x6e   : > { %p720_p0 = scmp.ge.s32.totalorder %s471_s0, 2  ;;  %s205_s25 = scalar_lea.sflag [#allocation6], %s204_s27 }
  0x70   : > { %p303_p5 = pnand %p720_p0, %p719_p13 }
  0x72   : > { %454 = dma.done.wait (!%p303_p5), %s205_s25, 128  }
  0x73   : > { %456 = vsyncadd (!%p303_p5), %s205_s25, 4294967168  ;;  %p18_p10 = scmp.ge.s32.totalorder %s544_s22, 4   ;;  %s721_s12 = smov %s463_s13 }
  0x74   : > { %s722_s13 = smov %s467_s14  ;;  %s723_s14 = smov %s580_s10 }
  0x75   : > { %s724_s0 = smov %s544_s22  ;;  %20 = sbr.rel (!%p18_p10) target bundleno = 6 (0x6), region = 77 }
  0x7c   :  { %210 = vsyncpa [#allocation5], 1 }
  0x7d   :  { %212 = vsyncpa [#allocation5 + $0x1], 1 }
  0x7e   :  { %213 = vsyncpa [#allocation8], 1 }
  0x7f   :  { %214 = vsyncpa [#allocation6], 1 }
  0x80   :  { %216 = vsyncpa [#allocation6 + $0x1], 1 }

</bundles_post_ra>
